<compile_context>
chip_gen: v6e
topology: v6e:2x2x1
jax: 0.10.0
libtpu: 0.0.40
codegen_flags: <defaults>
</compile_context>

<pallas_src>
import functools

import jax
import jax.numpy as jnp
from jax.experimental import pallas as pl
from jax.experimental.pallas import tpu as pltpu


def _coord_attention_kernel(x_ref, pool_ref, eh_ref, ew_ref,
                            w1t_ref, b1_ref, w2t_ref, b2_ref, w3t_ref, b3_ref,
                            out_ref, *, nb, C, H, W):
    # x_ref   : (R, HWp)   R = nb*C rows ordered (image, channel); lane = spatial
    # pool_ref: (HWp, H+W) concatenated mean-over-W / mean-over-H matrix (f32)
    # eh_ref  : (H, HWp)   one-hot expansion a_h(.,H) -> (., HWp)      (bf16)
    # ew_ref  : (W, HWp)   one-hot expansion a_w(.,W) -> (., HWp)      (bf16)
    # w1t_ref : (C, TC)    conv1 weight with BN1 scale folded in, transposed
    # b1_ref  : (TC, 1)    conv1-bias + BN1 bias, fused
    # w2t/w3t : (TC, C)    conv2 / conv3 weights, transposed
    # b2/b3   : (C, 1)     conv2 / conv3 biases
    S = H + W
    R = nb * C
    x = x_ref[...]                                                    # (R, HWp) f32

    # ---- coordinate pooling: one f32 MXU matmul with M = Nb*C --------------
    x_cat = jnp.dot(x, pool_ref[...], preferred_element_type=jnp.float32)  # (R, S)

    # ---- conv1 (BN folded) + h_swish: tiny channel mix on the VPU ----------
    xc3 = x_cat.reshape(nb, C, S)
    mid = jnp.sum(xc3[:, :, None, :] * w1t_ref[...][None, :, :, None],
                  axis=1)                                             # (nb, TC, S)
    mid = mid + b1_ref[...]
    mid = mid * jnp.clip(mid + 3.0, 0.0, 6.0) * (1.0 / 6.0)           # h_swish

    def sigmoid(z):
        return pl.reciprocal(1.0 + jnp.exp(-z), approx=True)         # exp+rcp on EUP

    # ---- conv2 / conv3 + sigmoid (tiny, VPU/EUP) ----------------------------
    mid_h = mid[:, :, :H]                                             # (nb, TC, H)
    mid_w = mid[:, :, H:]                                             # (nb, TC, W)
    a_h = sigmoid(jnp.sum(mid_h[:, :, None, :] * w2t_ref[...][None, :, :, None],
                          axis=1) + b2_ref[...])                      # (nb, C, H)
    a_w = sigmoid(jnp.sum(mid_w[:, :, None, :] * w3t_ref[...][None, :, :, None],
                          axis=1) + b3_ref[...])                      # (nb, C, W)

    # ---- broadcast back to (R, HWp) via bf16 one-hot MXU matmuls + apply ----
    ah_full = jnp.dot(a_h.reshape(R, H).astype(jnp.bfloat16), eh_ref[...],
                      preferred_element_type=jnp.float32)             # (R, HWp)
    aw_full = jnp.dot(a_w.reshape(R, W).astype(jnp.bfloat16), ew_ref[...],
                      preferred_element_type=jnp.float32)             # (R, HWp)
    out_ref[...] = (x * ah_full * aw_full).astype(out_ref.dtype)


def _choose_nb(N, C, HWp, itemsize=4, target_bytes=1 << 20):
    """Images per grid step: ~1 MiB blocks, 8-aligned rows, >=2 steps if possible."""
    per_img = C * HWp * itemsize
    want = max(1, min(N, target_bytes // max(per_img, 1)))
    cands = [d for d in range(1, N + 1)
             if N % d == 0 and ((d * C) % 8 == 0 or d == N)]
    multi = [d for d in cands if N // d >= 2]          # keep both v7x TCs busy
    pool_c = multi if multi else cands
    under = [d for d in pool_c if d <= want]
    return max(under) if under else min(pool_c)


def coord_attention_pallas(x_nchw, params, eps=1e-5):
    """CoordAttention forward. x_nchw: (N, C, H, W) f32, returns (N, C, H, W)."""
    N, C, H, W = x_nchw.shape
    HW = H * W
    HWp = ((HW + 127) // 128) * 128                    # lane-pad the spatial axis
    S = H + W
    TC = params["w1"].shape[0]

    nb = _choose_nb(N, C, HWp)
    R = nb * C

    # NCHW -> (N*C, HWp): contiguous reshape (+ zero lane-padding if needed).
    x2 = x_nchw.reshape(N * C, HW).astype(jnp.float32)
    if HWp != HW:
        x2 = jnp.pad(x2, ((0, 0), (0, HWp - HW)))

    # Constant pooling / expansion matrices (built once, tiny).
    p = jnp.arange(HWp)
    valid = (p < HW)
    eh_f = ((p[None, :] // W == jnp.arange(H)[:, None]) & valid[None, :]
            ).astype(jnp.float32)                      # (H, HWp)
    ew_f = ((p[None, :] % W == jnp.arange(W)[:, None]) & valid[None, :]
            ).astype(jnp.float32)                      # (W, HWp)
    pool = jnp.concatenate([eh_f.T * (1.0 / W), ew_f.T * (1.0 / H)], axis=1)  # (HWp, S)
    eh = eh_f.astype(jnp.bfloat16)                     # exact 0/1 in bf16
    ew = ew_f.astype(jnp.bfloat16)

    # Fold conv1 bias + inference-mode BN1 into the conv1 weight / bias.
    s1 = params["g1"] / jnp.sqrt(params["v1"] + eps)                       # (TC,)
    w1t = (params["w1"] * s1[:, None]).T.astype(jnp.float32)               # (C, TC)
    b1 = ((params["cb1"] - params["m1"]) * s1 + params["be1"]
          ).reshape(TC, 1).astype(jnp.float32)
    w2t = params["w2"].T.astype(jnp.float32)                               # (TC, C)
    b2 = params["cb2"].reshape(C, 1).astype(jnp.float32)
    w3t = params["w3"].T.astype(jnp.float32)                               # (TC, C)
    b3 = params["cb3"].reshape(C, 1).astype(jnp.float32)

    # VMEM budget: double-buffered in + out blocks, constants, margin.
    block_bytes = R * HWp * 4
    const_bytes = (pool.size * 4 + (eh.size + ew.size) * 2
                   + (w1t.size + w2t.size + w3t.size
                      + b1.size + b2.size + b3.size) * 4)
    vmem_limit = int(min(64 << 20,
                         max(4 * block_bytes + 2 * const_bytes + (2 << 20),
                             8 << 20)))

    def full(shape):
        return pl.BlockSpec(shape, lambda i, _nd=len(shape): (0,) * _nd)

    kernel = functools.partial(_coord_attention_kernel, nb=nb, C=C, H=H, W=W)

    out2 = pl.pallas_call(
        kernel,
        out_shape=jax.ShapeDtypeStruct((N * C, HWp), jnp.float32),
        grid=(N // nb,),
        in_specs=[
            pl.BlockSpec((R, HWp), lambda i: (i, 0)),    # x, Nb images per step
            full((HWp, S)),                              # pooling matrix (f32)
            full((H, HWp)), full((W, HWp)),              # one-hot expansions (bf16)
            full((C, TC)), full((TC, 1)),                # conv1 (BN folded) + bias
            full((TC, C)), full((C, 1)),                 # conv2
            full((TC, C)), full((C, 1)),                 # conv3
        ],
        out_specs=pl.BlockSpec((R, HWp), lambda i: (i, 0)),
        compiler_params=pltpu.CompilerParams(
            dimension_semantics=("parallel",),
            vmem_limit_bytes=vmem_limit),
    )(x2, pool, eh, ew, w1t, b1, w2t, b2, w3t, b3)

    if HWp != HW:
        out2 = out2[:, :HW]
    return out2.reshape(N, C, H, W)


def coord_attention_ref(x, params, eps=1e-5):
    """Pure-JAX reference (mirrors the PyTorch forward, inference-mode BN)."""
    N, C, H, W = x.shape
    x = x.astype(jnp.float32)
    x_h = jnp.mean(x, axis=3)                          # (N, C, H)
    x_w = jnp.mean(x, axis=2)                          # (N, C, W)
    x_cat = jnp.concatenate([x_h, x_w], axis=2)        # (N, C, H+W)

    y = jnp.einsum("tc,ncs->nts", params["w1"], x_cat) + params["cb1"][None, :, None]
    s1 = params["g1"] / jnp.sqrt(params["v1"] + eps)
    y = y * s1[None, :, None] + (params["be1"] - params["m1"] * s1)[None, :, None]
    y = y * jnp.clip(y + 3.0, 0.0, 6.0) / 6.0          # h_swish

    y_h, y_w = y[:, :, :H], y[:, :, H:]
    a_h = jax.nn.sigmoid(jnp.einsum("ot,nth->noh", params["w2"], y_h)
                         + params["cb2"][None, :, None])    # (N, C, H)
    a_w = jax.nn.sigmoid(jnp.einsum("ot,ntw->now", params["w3"], y_w)
                         + params["cb3"][None, :, None])    # (N, C, W)
    return x * a_h[:, :, :, None] * a_w[:, :, None, :]


def make_params(key, in_c, out_c, temp_c):
    ks = jax.random.split(key, 10)
    return {
        # conv1: 1x1, in_c -> temp_c (weight stored (temp_c, in_c)), with bias
        "w1": 0.3 * jax.random.normal(ks[0], (temp_c, in_c), jnp.float32),
        "cb1": 0.1 * jax.random.normal(ks[1], (temp_c,), jnp.float32),
        # bn1 (inference running stats)
        "g1": 0.5 + jax.random.uniform(ks[2], (temp_c,), jnp.float32),
        "be1": 0.1 * jax.random.normal(ks[3], (temp_c,), jnp.float32),
        "m1": 0.1 * jax.random.normal(ks[4], (temp_c,), jnp.float32),
        "v1": 0.5 + jax.random.uniform(ks[5], (temp_c,), jnp.float32),
        # conv2 / conv3: 1x1, temp_c -> out_c, with bias
        "w2": 0.3 * jax.random.normal(ks[6], (out_c, temp_c), jnp.float32),
        "cb2": 0.1 * jax.random.normal(ks[7], (out_c,), jnp.float32),
        "w3": 0.3 * jax.random.normal(ks[8], (out_c, temp_c), jnp.float32),
        "cb3": 0.1 * jax.random.normal(ks[9], (out_c,), jnp.float32),
    }


def _check(N, C, H, W, seed):
    key = jax.random.PRNGKey(seed)
    k_x, k_p = jax.random.split(key)
    reduction = 32
    temp_c = max(8, C // reduction)
    x = jax.random.normal(k_x, (N, C, H, W), jnp.float32)
    params = make_params(k_p, C, C, temp_c)

    out = jax.block_until_ready(coord_attention_pallas(x, params))
    ref = jax.block_until_ready(coord_attention_ref(x, params))

    assert out.shape == (N, C, H, W)
    err = jnp.max(jnp.abs(out - ref))
    # Attention weights go through bf16 (one-hot expansion operands) and an
    # approximate-EUP reciprocal in sigmoid -> compare at ~1-3% tolerance.
    assert jnp.allclose(out, ref, atol=2e-2, rtol=3e-2), (
        f"mismatch at {(N, C, H, W)}: max abs err = {err}")


if __name__ == "__main__":
    # Shapes implied by the module: small batch/channels, 16x16 spatial.
    _check(2, 4, 16, 16, seed=0)
    # Generalization guard: multi-step grid (batched blocks) + non-128 HW.
    _check(8, 8, 10, 10, seed=0)
    print("KERNEL_OK")
</pallas_src>

<mosaic_0001>
module attributes {stable_mosaic.version = 11 : i64} {
  func.func @_coord_attention_kernel(%arg0: i32, %arg1: memref<8x256xf32, #tpu.memory_space<vmem>>, %arg2: memref<256x32xf32, #tpu.memory_space<vmem>>, %arg3: memref<16x256xbf16, #tpu.memory_space<vmem>>, %arg4: memref<16x256xbf16, #tpu.memory_space<vmem>>, %arg5: memref<4x8xf32, #tpu.memory_space<vmem>>, %arg6: memref<8x1xf32, #tpu.memory_space<vmem>>, %arg7: memref<8x4xf32, #tpu.memory_space<vmem>>, %arg8: memref<4x1xf32, #tpu.memory_space<vmem>>, %arg9: memref<8x4xf32, #tpu.memory_space<vmem>>, %arg10: memref<4x1xf32, #tpu.memory_space<vmem>>, %arg11: memref<8x256xf32, #tpu.memory_space<vmem>>) attributes {dimension_semantics = [#tpu.dimension_semantics<parallel>], iteration_bounds = array<i64: 1>, scalar_prefetch = 0 : i64, scratch_operands = 0 : i64, tpu.core_type = #tpu.core_type<tc>, window_params = [{transform_indices = @transform_0, window_bounds = array<i64: 8, 256>}, {pipeline_mode = #tpu.pipeline_mode<synchronous>, transform_indices = @transform_1, window_bounds = array<i64: 256, 32>}, {pipeline_mode = #tpu.pipeline_mode<synchronous>, transform_indices = @transform_2, window_bounds = array<i64: 16, 256>}, {pipeline_mode = #tpu.pipeline_mode<synchronous>, transform_indices = @transform_3, window_bounds = array<i64: 16, 256>}, {pipeline_mode = #tpu.pipeline_mode<synchronous>, transform_indices = @transform_4, window_bounds = array<i64: 4, 8>}, {pipeline_mode = #tpu.pipeline_mode<synchronous>, transform_indices = @transform_5, window_bounds = array<i64: 8, 1>}, {pipeline_mode = #tpu.pipeline_mode<synchronous>, transform_indices = @transform_6, window_bounds = array<i64: 8, 4>}, {pipeline_mode = #tpu.pipeline_mode<synchronous>, transform_indices = @transform_7, window_bounds = array<i64: 4, 1>}, {pipeline_mode = #tpu.pipeline_mode<synchronous>, transform_indices = @transform_8, window_bounds = array<i64: 8, 4>}, {pipeline_mode = #tpu.pipeline_mode<synchronous>, transform_indices = @transform_9, window_bounds = array<i64: 4, 1>}, {transform_indices = @transform_10, window_bounds = array<i64: 8, 256>}]} {
    %c0 = arith.constant 0 : index
    %c0_0 = arith.constant 0 : index
    %0 = vector.load %arg1[%c0, %c0_0] : memref<8x256xf32, #tpu.memory_space<vmem>>, vector<8x256xf32>
    %c0_1 = arith.constant 0 : index
    %c0_2 = arith.constant 0 : index
    %1 = vector.load %arg2[%c0_1, %c0_2] : memref<256x32xf32, #tpu.memory_space<vmem>>, vector<256x32xf32>
    %cst = arith.constant dense<0.000000e+00> : vector<8x32xf32>
    %2 = tpu.matmul %0, %1, %cst {dimension_numbers = #tpu.dot_dimension_numbers<[1], [0], [0], [1], [0, 0, 1, 1], [], []>} : vector<8x256xf32>, vector<256x32xf32>, vector<8x32xf32> -> vector<8x32xf32>
    %3 = vector.shape_cast %2 : vector<8x32xf32> to vector<2x4x32xf32>
    %4 = vector.shape_cast %3 : vector<2x4x32xf32> to vector<2x4x1x32xf32>
    %c0_3 = arith.constant 0 : index
    %c0_4 = arith.constant 0 : index
    %5 = vector.load %arg5[%c0_3, %c0_4] : memref<4x8xf32, #tpu.memory_space<vmem>>, vector<4x8xf32>
    %6 = vector.shape_cast %5 : vector<4x8xf32> to vector<1x4x8x1xf32>
    %7 = vector.broadcast %4 : vector<2x4x1x32xf32> to vector<2x4x8x32xf32>
    %8 = vector.broadcast %6 : vector<1x4x8x1xf32> to vector<2x4x8x32xf32>
    %9 = arith.mulf %7, %8 : vector<2x4x8x32xf32>
    %cst_5 = arith.constant dense<0.000000e+00> : vector<2x8x32xf32>
    %10 = vector.multi_reduction <add>, %9, %cst_5 [1] : vector<2x4x8x32xf32> to vector<2x8x32xf32>
    %c0_6 = arith.constant 0 : index
    %c0_7 = arith.constant 0 : index
    %11 = vector.load %arg6[%c0_6, %c0_7] : memref<8x1xf32, #tpu.memory_space<vmem>>, vector<8x1xf32>
    %12 = vector.shape_cast %11 : vector<8x1xf32> to vector<1x8x1xf32>
    %13 = vector.broadcast %12 : vector<1x8x1xf32> to vector<2x8x32xf32>
    %14 = arith.addf %10, %13 : vector<2x8x32xf32>
    %cst_8 = arith.constant 3.000000e+00 : f32
    %15 = vector.broadcast %cst_8 : f32 to vector<2x8x32xf32>
    %16 = arith.addf %14, %15 : vector<2x8x32xf32>
    %cst_9 = arith.constant 0.000000e+00 : f32
    %cst_10 = arith.constant 6.000000e+00 : f32
    %17 = vector.broadcast %cst_9 : f32 to vector<2x8x32xf32>
    %18 = arith.maximumf %17, %16 : vector<2x8x32xf32>
    %19 = vector.broadcast %cst_10 : f32 to vector<2x8x32xf32>
    %20 = arith.minimumf %19, %18 : vector<2x8x32xf32>
    %21 = arith.mulf %14, %20 : vector<2x8x32xf32>
    %cst_11 = arith.constant 0.166666672 : f32
    %22 = vector.broadcast %cst_11 : f32 to vector<2x8x32xf32>
    %23 = arith.mulf %21, %22 : vector<2x8x32xf32>
    %24 = vector.extract_strided_slice %23 {offsets = [0, 0, 0], sizes = [2, 8, 16], strides = [1, 1, 1]} : vector<2x8x32xf32> to vector<2x8x16xf32>
    %25 = vector.extract_strided_slice %23 {offsets = [0, 0, 16], sizes = [2, 8, 16], strides = [1, 1, 1]} : vector<2x8x32xf32> to vector<2x8x16xf32>
    %26 = vector.shape_cast %24 : vector<2x8x16xf32> to vector<2x8x1x16xf32>
    %c0_12 = arith.constant 0 : index
    %c0_13 = arith.constant 0 : index
    %27 = vector.load %arg7[%c0_12, %c0_13] : memref<8x4xf32, #tpu.memory_space<vmem>>, vector<8x4xf32>
    %28 = vector.shape_cast %27 : vector<8x4xf32> to vector<1x8x4x1xf32>
    %29 = vector.broadcast %26 : vector<2x8x1x16xf32> to vector<2x8x4x16xf32>
    %30 = vector.broadcast %28 : vector<1x8x4x1xf32> to vector<2x8x4x16xf32>
    %31 = arith.mulf %29, %30 : vector<2x8x4x16xf32>
    %cst_14 = arith.constant dense<0.000000e+00> : vector<2x4x16xf32>
    %32 = vector.multi_reduction <add>, %31, %cst_14 [1] : vector<2x8x4x16xf32> to vector<2x4x16xf32>
    %c0_15 = arith.constant 0 : index
    %c0_16 = arith.constant 0 : index
    %33 = vector.load %arg8[%c0_15, %c0_16] : memref<4x1xf32, #tpu.memory_space<vmem>>, vector<4x1xf32>
    %34 = vector.shape_cast %33 : vector<4x1xf32> to vector<1x4x1xf32>
    %35 = vector.broadcast %34 : vector<1x4x1xf32> to vector<2x4x16xf32>
    %36 = arith.addf %32, %35 : vector<2x4x16xf32>
    %cst_17 = arith.constant 0.000000e+00 : f32
    %37 = vector.broadcast %cst_17 : f32 to vector<2x4x16xf32>
    %38 = arith.subf %37, %36 : vector<2x4x16xf32>
    %39 = math.exp %38 : vector<2x4x16xf32>
    %cst_18 = arith.constant 1.000000e+00 : f32
    %40 = vector.broadcast %cst_18 : f32 to vector<2x4x16xf32>
    %41 = arith.addf %40, %39 : vector<2x4x16xf32>
    %42 = tpu.reciprocal %41 {approx = true} : vector<2x4x16xf32> -> vector<2x4x16xf32>
    %43 = vector.shape_cast %25 : vector<2x8x16xf32> to vector<2x8x1x16xf32>
    %c0_19 = arith.constant 0 : index
    %c0_20 = arith.constant 0 : index
    %44 = vector.load %arg9[%c0_19, %c0_20] : memref<8x4xf32, #tpu.memory_space<vmem>>, vector<8x4xf32>
    %45 = vector.shape_cast %44 : vector<8x4xf32> to vector<1x8x4x1xf32>
    %46 = vector.broadcast %43 : vector<2x8x1x16xf32> to vector<2x8x4x16xf32>
    %47 = vector.broadcast %45 : vector<1x8x4x1xf32> to vector<2x8x4x16xf32>
    %48 = arith.mulf %46, %47 : vector<2x8x4x16xf32>
    %cst_21 = arith.constant dense<0.000000e+00> : vector<2x4x16xf32>
    %49 = vector.multi_reduction <add>, %48, %cst_21 [1] : vector<2x8x4x16xf32> to vector<2x4x16xf32>
    %c0_22 = arith.constant 0 : index
    %c0_23 = arith.constant 0 : index
    %50 = vector.load %arg10[%c0_22, %c0_23] : memref<4x1xf32, #tpu.memory_space<vmem>>, vector<4x1xf32>
    %51 = vector.shape_cast %50 : vector<4x1xf32> to vector<1x4x1xf32>
    %52 = vector.broadcast %51 : vector<1x4x1xf32> to vector<2x4x16xf32>
    %53 = arith.addf %49, %52 : vector<2x4x16xf32>
    %cst_24 = arith.constant 0.000000e+00 : f32
    %54 = vector.broadcast %cst_24 : f32 to vector<2x4x16xf32>
    %55 = arith.subf %54, %53 : vector<2x4x16xf32>
    %56 = math.exp %55 : vector<2x4x16xf32>
    %cst_25 = arith.constant 1.000000e+00 : f32
    %57 = vector.broadcast %cst_25 : f32 to vector<2x4x16xf32>
    %58 = arith.addf %57, %56 : vector<2x4x16xf32>
    %59 = tpu.reciprocal %58 {approx = true} : vector<2x4x16xf32> -> vector<2x4x16xf32>
    %60 = vector.shape_cast %42 : vector<2x4x16xf32> to vector<8x16xf32>
    %61 = arith.truncf %60 : vector<8x16xf32> to vector<8x16xbf16>
    %c0_26 = arith.constant 0 : index
    %c0_27 = arith.constant 0 : index
    %62 = vector.load %arg3[%c0_26, %c0_27] : memref<16x256xbf16, #tpu.memory_space<vmem>>, vector<16x256xbf16>
    %cst_28 = arith.constant dense<0.000000e+00> : vector<8x256xf32>
    %63 = tpu.matmul %61, %62, %cst_28 {dimension_numbers = #tpu.dot_dimension_numbers<[1], [0], [0], [1], [0, 0, 1, 1], [], []>} : vector<8x16xbf16>, vector<16x256xbf16>, vector<8x256xf32> -> vector<8x256xf32>
    %64 = vector.shape_cast %59 : vector<2x4x16xf32> to vector<8x16xf32>
    %65 = arith.truncf %64 : vector<8x16xf32> to vector<8x16xbf16>
    %c0_29 = arith.constant 0 : index
    %c0_30 = arith.constant 0 : index
    %66 = vector.load %arg4[%c0_29, %c0_30] : memref<16x256xbf16, #tpu.memory_space<vmem>>, vector<16x256xbf16>
    %cst_31 = arith.constant dense<0.000000e+00> : vector<8x256xf32>
    %67 = tpu.matmul %65, %66, %cst_31 {dimension_numbers = #tpu.dot_dimension_numbers<[1], [0], [0], [1], [0, 0, 1, 1], [], []>} : vector<8x16xbf16>, vector<16x256xbf16>, vector<8x256xf32> -> vector<8x256xf32>
    %68 = arith.mulf %0, %63 : vector<8x256xf32>
    %69 = arith.mulf %68, %67 : vector<8x256xf32>
    %c0_32 = arith.constant 0 : index
    %c0_33 = arith.constant 0 : index
    %70 = vector.load %arg11[%c0_32, %c0_33] : memref<8x256xf32, #tpu.memory_space<vmem>>, vector<8x256xf32>
    tpu.vector_store %arg11[%c0_32, %c0_33], %69 {strides = array<i32>} : memref<8x256xf32, #tpu.memory_space<vmem>>, vector<8x256xf32>,
    return
  }
  func.func @transform_0(%arg0: i32) -> (i32, i32) {
    %c0_i32 = arith.constant 0 : i32
    %c0_i32_0 = arith.constant 0 : i32
    return %arg0, %c0_i32 : i32, i32
  }
  func.func @transform_1(%arg0: i32) -> (i32, i32) {
    %c0_i32 = arith.constant 0 : i32
    %c0_i32_0 = arith.constant 0 : i32
    %c0_i32_1 = arith.constant 0 : i32
    return %c0_i32, %c0_i32_0 : i32, i32
  }
  func.func @transform_2(%arg0: i32) -> (i32, i32) {
    %c0_i32 = arith.constant 0 : i32
    %c0_i32_0 = arith.constant 0 : i32
    %c0_i32_1 = arith.constant 0 : i32
    return %c0_i32, %c0_i32_0 : i32, i32
  }
  func.func @transform_3(%arg0: i32) -> (i32, i32) {
    %c0_i32 = arith.constant 0 : i32
    %c0_i32_0 = arith.constant 0 : i32
    %c0_i32_1 = arith.constant 0 : i32
    return %c0_i32, %c0_i32_0 : i32, i32
  }
  func.func @transform_4(%arg0: i32) -> (i32, i32) {
    %c0_i32 = arith.constant 0 : i32
    %c0_i32_0 = arith.constant 0 : i32
    %c0_i32_1 = arith.constant 0 : i32
    return %c0_i32, %c0_i32_0 : i32, i32
  }
  func.func @transform_5(%arg0: i32) -> (i32, i32) {
    %c0_i32 = arith.constant 0 : i32
    %c0_i32_0 = arith.constant 0 : i32
    %c0_i32_1 = arith.constant 0 : i32
    return %c0_i32, %c0_i32_0 : i32, i32
  }
  func.func @transform_6(%arg0: i32) -> (i32, i32) {
    %c0_i32 = arith.constant 0 : i32
    %c0_i32_0 = arith.constant 0 : i32
    %c0_i32_1 = arith.constant 0 : i32
    return %c0_i32, %c0_i32_0 : i32, i32
  }
  func.func @transform_7(%arg0: i32) -> (i32, i32) {
    %c0_i32 = arith.constant 0 : i32
    %c0_i32_0 = arith.constant 0 : i32
    %c0_i32_1 = arith.constant 0 : i32
    return %c0_i32, %c0_i32_0 : i32, i32
  }
  func.func @transform_8(%arg0: i32) -> (i32, i32) {
    %c0_i32 = arith.constant 0 : i32
    %c0_i32_0 = arith.constant 0 : i32
    %c0_i32_1 = arith.constant 0 : i32
    return %c0_i32, %c0_i32_0 : i32, i32
  }
  func.func @transform_9(%arg0: i32) -> (i32, i32) {
    %c0_i32 = arith.constant 0 : i32
    %c0_i32_0 = arith.constant 0 : i32
    %c0_i32_1 = arith.constant 0 : i32
    return %c0_i32, %c0_i32_0 : i32, i32
  }
  func.func @transform_10(%arg0: i32) -> (i32, i32) {
    %c0_i32 = arith.constant 0 : i32
    %c0_i32_0 = arith.constant 0 : i32
    return %arg0, %c0_i32 : i32, i32
  }
}

</mosaic_0001>

<bundles_post_ra>
// kernel: tpu_custom_call.1
= control target key start
LH: loop header
LB: loop body
LE: loop exit
PB: predicated region body
PF: predicated region fallthrough
CT: control target
= control target key end

     0   :  { %v146_v3 = vlaneseq  ;;  %v962_v5 = vmov 0   ;;  %s1335_s0 = inlined_call_operand.vmem [shape: f32[8,256], index: 0, kind: input, shape index: {}]   ;;  %s1336_s1 = inlined_call_operand.vmem [shape: f32[256,32], index: 1, kind: input, shape index: {}]   ;;  %s1337_s2 = inlined_call_operand.vmem [shape: bf16[16,256], index: 2, kind: input, shape index: {}]   ;;  %s1338_s3 = inlined_call_operand.vmem [shape: bf16[16,256], index: 3, kind: input, shape index: {}]   ;;  %s1339_s4 = inlined_call_operand.vmem [shape: f32[4,8], index: 4, kind: input, shape index: {}]   ;;  %s1340_s5 = inlined_call_operand.vmem [shape: f32[8,1], index: 5, kind: input, shape index: {}]   ;;  %s1341_s6 = inlined_call_operand.vmem [shape: f32[8,4], index: 6, kind: input, shape index: {}]   ;;  %s1342_s7 = inlined_call_operand.vmem [shape: f32[4,1], index: 7, kind: input, shape index: {}]   ;;  %s1343_s8 = inlined_call_operand.vmem [shape: f32[8,4], index: 8, kind: input, shape index: {}]   ;;  %s1344_s9 = inlined_call_operand.vmem [shape: f32[4,1], index: 9, kind: input, shape index: {}]   ;;  %s1345_s10 = inlined_call_operand.hbm [shape: f32[8,256], index: 10, kind: output, shape index: {}]  }
   0x1   :  { %v70_v0 = vld [vmem:[%s1336_s1 + $0xf8] sm:$0xff]  ;;  %v69_v2 = vld [vmem:[%s1336_s1 + $0xf0] sm:$0xff]  ;;  %916 = vset.pattern.permute.xlu0 %v962_v5  ;;  %v68_v6 = vld [vmem:[%s1336_s1 + $0xe8] sm:$0xff]  ;;  %917 = vset.pattern.permute.xlu1 %v962_v5 }
   0x2   :  { %v54_v1 = vld [vmem:[%s1336_s1 + $0x78] sm:$0xff]  ;;  %877 = vmatprep.subr.mxu0 %v70_v0  ;;  %v53_v4 = vld [vmem:[%s1336_s1 + $0x70] sm:$0xff]  ;;  %v52_v7 = vld [vmem:[%s1336_s1 + $0x68] sm:$0xff]  ;;  %778 = vmatprep.mubr.bf16.mxu1 %v962_v5  ;;  %v1045_v9 = vshrl.u32 %v146_v3, 7 }
   0x3   :  { %878 = vmatpush3.msra.mxu0 %v54_v1  ;;  %v67_v8 = vld [vmem:[%s1336_s1 + $0xe0] sm:$0xff]  ;;  %v66_v11 = vld [vmem:[%s1336_s1 + $0xd8] sm:$0xff]  ;;  %v65_v13 = vld [vmem:[%s1336_s1 + $0xd0] sm:$0xff] }
   0x4   :  { %879 = vmatprep.subr.mxu0 %v69_v2  ;;  %v51_v10 = vld [vmem:[%s1336_s1 + $0x60] sm:$0xff]  ;;  %v50_v12 = vld [vmem:[%s1336_s1 + $0x58] sm:$0xff]  ;;  %v1060_v14 = vsub.s32 0, %v1045_v9  ;;  %v1063_v15 = vsub.s32 2, %v1045_v9  ;;  %v49_v16 = vld [vmem:[%s1336_s1 + $0x50] sm:$0xff]  ;;  %v1077_v19 = vsub.s32 1, %v1045_v9 }
   0x5   :  { %880 = vmatpush3.msra.mxu0 %v53_v4  ;;  %v64_v17 = vld [vmem:[%s1336_s1 + $0xc8] sm:$0xff]  ;;  %v191_v21 = vld [vmem:[%s1339_s4] sm:$0xf]  ;;  %v1087_v22 = vsub.s32 3, %v1045_v9  ;;  %v62_v27 = vld [vmem:[%s1336_s1 + $0xb8] sm:$0xff] }
   0x6   :  { %881 = vmatprep.subr.mxu0 %v68_v6  ;;  %v1074_v18 = vld [vmem:[%s1335_s0 + $0x8] sm:$0xff]  ;;  %v63_v23 = vld [vmem:[%s1336_s1 + $0xc0] sm:$0xff]  ;;  %v195_v25 = vrot.slane %v191_v21, %v1060_v14  ;;  %v209_v26 = vrot.slane %v191_v21, %v1063_v15  ;;  %v202_v28 = vrot.slane %v191_v21, %v1077_v19 }
   0x7   :  { %882 = vmatpush3.msra.mxu0 %v52_v7  ;;  %v48_v20 = vld [vmem:[%s1336_s1 + $0x48] sm:$0xff]  ;;  %135 = vmatprep.mubr.f32.mxu0 %v1074_v18  ;;  %v47_v24 = vld [vmem:[%s1336_s1 + $0x40] sm:$0xff] }
   0x8   :  { %883 = vmatprep.subr.mxu0 %v67_v8  ;;  %197 = vbcast.lane.b32.xlu0 %v195_v25, 256 }
   0x9   :  { %884 = vmatpush3.msra.mxu0 %v51_v10 }
   0xa   :  { %885 = vmatprep.subr.mxu0 %v66_v11 }
   0xb   :  { %886 = vmatpush3.msra.mxu0 %v50_v12 }
   0xc   :  { %887 = vmatprep.subr.mxu0 %v65_v13 }
   0xd   :  { %888 = vmatpush3.msra.mxu0 %v49_v16 }
   0xe   :  { %889 = vmatprep.subr.mxu0 %v64_v17 }
   0xf   :  { %890 = vmatpush3.msra.mxu0 %v48_v20 }
  0x10   :  { %15 = vsyncpa [#allocation3], 0  ;;  %891 = vmatprep.subr.mxu0 %v63_v23  ;;  %v46_v29 = vld [vmem:[%s1336_s1 + $0x38] sm:$0xff]  ;;  %211 = vbcast.lane.b32.xlu1 %v209_v26, 256  ;;  %v216_v30 = vrot.slane %v191_v21, %v1087_v22  ;;  %v61_v31 = vld [vmem:[%s1336_s1 + $0xb0] sm:$0xff]  ;;  %v432_v42 = vsub.s32 4, %v1045_v9 }
  0x11   :  { %892 = vmatpush3.msra.mxu0 %v47_v24  ;;  %v45_v32 = vld [vmem:[%s1336_s1 + $0x30] sm:$0xff]  ;;  %v60_v33 = vld [vmem:[%s1336_s1 + $0xa8] sm:$0xff]  ;;  %204 = vbcast.lane.b32.xlu0 %v202_v28, 256  ;;  %v603_v34 = vld [vmem:[%s1343_s8] sm:$0xff]  ;;  %v446_v49 = vsub.s32 6, %v1045_v9  ;;  %v439_v52 = vsub.s32 5, %v1045_v9 }
  0x12   :  { %893 = vmatprep.subr.mxu0 %v62_v27  ;;  %v44_v35 = vld [vmem:[%s1336_s1 + $0x28] sm:$0xff]  ;;  %v283_v36 = vld [vmem:[%s1340_s5] sm:$0xff]  ;;  %v607_v37 = vrot.slane %v603_v34, %v1060_v14  ;;  %v58_v40 = vld [vmem:[%s1336_s1 + $0x98] sm:$0xff]  ;;  %v621_v41 = vrot.slane %v603_v34, %v1063_v15  ;;  %v614_v44 = vrot.slane %v603_v34, %v1077_v19  ;;  %v635_v48 = vrot.slane %v603_v34, %v432_v42  ;;  %s965_s30 = smov [#allocation2]  }
  0x13   :  { %894 = vmatpush3.msra.mxu0 %v46_v29  ;;  %v59_v38 = vld [vmem:[%s1336_s1 + $0xa0] sm:$0xff]  ;;  %v42_v43 = vld [vmem:[%s1336_s1 + $0x18] sm:$0xff]  ;;  %v57_v45 = vld [vmem:[%s1336_s1 + $0x90] sm:$0xff]  ;;  %v628_v51 = vrot.slane %v603_v34, %v1087_v22  ;;  %v649_v56 = vrot.slane %v603_v34, %v446_v49  ;;  %v642_v57 = vrot.slane %v603_v34, %v439_v52  ;;  %v453_v58 = vsub.s32 7, %v1045_v9  ;;  %s863_s4 = sshll.u32 %s965_s30, 4  ;;  %s864_s4 = int_to_ptr.vmem [resolvable:$true] %s863_s4 }
  0x14   :  { %895 = vmatprep.subr.mxu0 %v61_v31  ;;  %218 = vbcast.lane.b32.xlu1 %v216_v30, 256  ;;  %v43_v39 = vld [vmem:[%s1336_s1 + $0x20] sm:$0xff]  ;;  %v41_v46 = vld [vmem:[%s1336_s1 + $0x10] sm:$0xff]  ;;  %v56_v47 = vld [vmem:[%s1336_s1 + $0x88] sm:$0xff]  ;;  %v963_v12 = vmov 1966171168   ;;  %p945_p1 = scmp.lt.s32.totalorder %s864_s4, %s864_s4 }
  0x15   :  { %896 = vmatpush3.msra.mxu0 %v45_v32  ;;  %286 = vperm.xlu0 %916, %v283_v36   ;;  %v40_v50 = vld [vmem:[%s1336_s1 + $0x8] sm:$0xff]  ;;  %v55_v53 = vld [vmem:[%s1336_s1 + $0x80] sm:$0xff]  ;;  %v656_v60 = vrot.slane %v603_v34, %v453_v58  ;;  %v144_v13 = vunpack.c.l.s4 %v963_v12  ;;  %vm268_vm0 = vcmask 261120   ;;  %vm676_vm1 = vcmask 257152  }
  0x16   :  { %897 = vmatprep.subr.mxu0 %v60_v33  ;;  %v39_v54 = vld [vmem:[%s1336_s1] sm:$0xff]  ;;  %vm554_vm2 = vcmask 125952   ;;  %vm742_vm3 = vcmask 130048  }
  0x17   :  { %898 = vmatpush3.msra.mxu0 %v44_v35  ;;  %v1163_v55 = vld [vmem:[%s1335_s0] sm:$0xff] }
  0x18   :  { %899 = vmatprep.subr.mxu0 %v59_v38  ;;  %609 = vbcast.lane.b32.xlu1 %v607_v37, 256  ;;  %v707_v59 = vld [vmem:[%s1344_s9] sm:$0xf]  ;;  %v918_v8 = vld [vmem:[%s1337_s2 + $0x4] ss:$8 sps:$4 sm:$0xff]  }
  0x19   :  { %900 = vmatpush3.msra.mxu0 %v43_v39  ;;  %623 = vbcast.lane.b32.xlu0 %v621_v41, 256  ;;  %v401_v61 = vld [vmem:[%s1341_s6] sm:$0xff] }
  0x1a   :  { %901 = vmatprep.subr.mxu0 %v58_v40  ;;  %v412_v62 = vrot.slane %v401_v61, %v1077_v19  ;;  %v405_v63 = vrot.slane %v401_v61, %v1060_v14  ;;  %v426_v0 = vrot.slane %v401_v61, %v1087_v22  ;;  %v419_v1 = vrot.slane %v401_v61, %v1063_v15  ;;  %v585_v7 = vld [vmem:[%s1342_s7] sm:$0xf]  ;;  %v923_v11 = vld [vmem:[%s1338_s3 + $0x4] ss:$8 sps:$4 sm:$0xff]  }
  0x1b   :  { %902 = vmatpush3.msra.mxu0 %v42_v43  ;;  %v440_v2 = vrot.slane %v401_v61, %v439_v52  ;;  %v433_v3 = vrot.slane %v401_v61, %v432_v42  ;;  %v454_v4 = vrot.slane %v401_v61, %v453_v58  ;;  %v447_v6 = vrot.slane %v401_v61, %v446_v49  ;;  %v920_v10 = vld [vmem:[%s1337_s2] ss:$8 sps:$4 sm:$0xff]   ;;  %s964_s2 = smov 112  }
  0x1c   :  { %903 = vmatprep.subr.mxu0 %v57_v45  ;;  %616 = vbcast.lane.b32.xlu1 %v614_v44, 256  ;;  %v145_v15 = vunpack.c.0.s8 %v144_v13 }
  0x1d   :  { %904 = vmatpush3.msra.mxu0 %v41_v46  ;;  %637 = vbcast.lane.b32.xlu0 %v635_v48, 256 }
  0x1e   :  { %905 = vmatprep.subr.mxu0 %v56_v47  ;;  %760 = vmatprep.subr.bf16.mxu1 %v918_v8  ;;  %v1190_v17 = vsub.s32 %v145_v15, %v1045_v9 }
  0x1f   :  { %906 = vmatpush3.msra.mxu0 %v40_v50  ;;  %761 = vmatpush1.bf16.msra.mxu1 %v920_v10 }
  0x20   :  { %907 = vmatprep.subr.mxu0 %v55_v53  ;;  %630 = vbcast.lane.b32.xlu1 %v628_v51, 256 }
  0x21   :  { %908 = vmatpush3.msra.mxu0 %v39_v54  ;;  %651 = vbcast.lane.b32.xlu0 %v649_v56, 256 }
  0x22   :  { %136 = vmatmul.mubr.f32.vlgmr.msra.gmra.mxu0 %v1163_v55  ;;  %824 = vmatprep.subr.bf16.mxu1 %v923_v11 }
  0x24   :  { %644 = vbcast.lane.b32.xlu1 %v642_v57, 256 }
  0x25   :  { %710 = vperm.xlu0 %916, %v707_v59  }
  0x28   :  { %658 = vbcast.lane.b32.xlu1 %v656_v60, 256 }
  0x29   :  { %414 = vbcast.lane.b32.xlu0 %v412_v62, 256 }
  0x2c   :  { %407 = vbcast.lane.b32.xlu1 %v405_v63, 256 }
  0x2d   :  { %428 = vbcast.lane.b32.xlu0 %v426_v0, 256 }
  0x30   :  { %421 = vbcast.lane.b32.xlu1 %v419_v1, 256 }
  0x31   :  { %442 = vbcast.lane.b32.xlu0 %v440_v2, 256 }
  0x34   :  { %435 = vbcast.lane.b32.xlu1 %v433_v3, 256 }
  0x35   :  { %456 = vbcast.lane.b32.xlu0 %v454_v4, 256 }
  0x38   :  { %449 = vbcast.lane.b32.xlu1 %v447_v6, 256 }
  0x3c   :  { %588 = vperm.xlu1 %917, %v585_v7  }
  0x7a   :  { %v198_v24 = vpop.permute.xlu0 %197 }
  0x82   :  { %v212_v21 = vpop.permute.xlu1 %211 }
  0x83   :  { %v205_v41 = vpop.permute.xlu0 %204 }
  0x86   :  { %v219_v9 = vpop.permute.xlu1 %218 }
  0x8a   :  { %v610_v50 = vpop.permute.xlu1 %609 }
  0x8e   :  { %v617_v6 = vpop.permute.xlu1 %616 }
  0x90   :  { %v287_v1 = vpop.permute.xlu0 %286 }
  0x94   :  { %v624_v13 = vpop.permute.xlu0 %623 }
  0xe2   :  { %v909_v16 = vpop.f32.mrf.mxu0 }
  0xe4   :  { %v910_v19 = vpop.f32.mrf.mxu0 }
  0xe5   :  { %v911_v20 = vadd.f32 %v910_v19, %v909_v16  ;;  %v1214_v16 = vpop.permute.xlu1 %630 }
  0xe7   :  { %v142_v22 = vcombine.high %v911_v20, %v911_v20  ;;  %v149_v23 = vrot.slane %v911_v20, %v1190_v17 }
  0xe9   :  { %v156_v25 = vrot.slane %v142_v22, %v1190_v17  ;;  %v157_v26 = vcombine.high %v149_v23, %v149_v23  ;;  %v165_v27 = vrot.slane %v149_v23, %v1190_v17 }
  0xeb   :  { %v158_v28 = vcombine.high %v156_v25, %v156_v25  ;;  %v172_v29 = vrot.slane %v156_v25, %v1190_v17  ;;  %v223_v30 = vrot.slane %v165_v27, %v1060_v14  ;;  %v187_v31 = vcombine.high %v165_v27, %v165_v27 }
  0xec   :  { %v179_v32 = vrot.slane %v157_v26, %v1190_v17  ;;  %v1216_v26 = vpop.permute.xlu1 %644 }
  0xed   :  { %v239_v33 = vrot.slane %v172_v29, %v1060_v14  ;;  %v188_v34 = vcombine.high %v172_v29, %v172_v29  ;;  %v231_v35 = vrot.slane %v187_v31, %v1060_v14  ;;  %v186_v36 = vrot.slane %v158_v28, %v1190_v17 }
  0xee   :  { %v227_v37 = vrot.slane %v179_v32, %v1060_v14  ;;  %v260_v38 = vmul.f32 %v223_v30, %v198_v24  ;;  %v189_v39 = vcombine.high %v179_v32, %v179_v32 }
  0xef   :  { %v247_v40 = vrot.slane %v188_v34, %v1060_v14  ;;  %v243_v42 = vrot.slane %v186_v36, %v1060_v14  ;;  %v264_v43 = vmul.f32 %v239_v33, %v198_v24  ;;  %v262_v44 = vmul.f32 %v231_v35, %v212_v21  ;;  %v638_v24 = vpop.permute.xlu0 %637 }
  0xf0   :  { %v261_v45 = vmul.f32 %v227_v37, %v205_v41  ;;  %v190_v46 = vcombine.high %v186_v36, %v186_v36  ;;  %v235_v47 = vrot.slane %v189_v39, %v1060_v14  ;;  %v269_v51 = vsel %vm268_vm0, %v260_v38, 0.0 }
  0xf1   :  { %v266_v48 = vmul.f32 %v247_v40, %v212_v21  ;;  %v265_v49 = vmul.f32 %v243_v42, %v205_v41  ;;  %v276_v57 = vsel %vm268_vm0, %v264_v43, 0.0  ;;  %v272_v59 = vsel %vm268_vm0, %v262_v44, 0.0  ;;  %v1227_v42 = vpop.permute.xlu1 %658 }
  0xf2   :  { %v270_v52 = vsel %vm268_vm0, %v261_v45, 0.0  ;;  %v251_v53 = vrot.slane %v190_v46, %v1060_v14  ;;  %v263_v54 = vmul.f32 %v235_v47, %v219_v9 }
  0xf3   :  { %v271_v56 = vadd.f32 %v270_v52, %v269_v51  ;;  %v277_v58 = vsel %vm268_vm0, %v265_v49, 0.0  ;;  %v279_v62 = vsel %vm268_vm0, %v266_v48, 0.0  ;;  %v652_v37 = vpop.permute.xlu0 %651 }
  0xf4   :  { %v278_v60 = vadd.f32 %v277_v58, %v276_v57  ;;  %v267_v61 = vmul.f32 %v251_v53, %v219_v9  ;;  %v274_v0 = vsel %vm268_vm0, %v263_v54, 0.0 }
  0xf5   :  { %v273_v63 = vadd.f32 %v272_v59, %v271_v56 }
  0xf6   :  { %v280_v2 = vadd.f32 %v279_v62, %v278_v60  ;;  %v281_v3 = vsel %vm268_vm0, %v267_v61, 0.0 }
  0xf7   :  { %v275_v4 = vadd.f32 %v274_v0, %v273_v63  ;;  %v1258_v0 = vpop.permute.xlu0 %710 }
  0xf8   :  { %v282_v7 = vadd.f32 %v281_v3, %v280_v2 }
  0xf9   :  { %v289_v8 = vadd.f32 %v287_v1, %v275_v4 }
  0xfa   :  { %v290_v10 = vadd.f32 %v287_v1, %v282_v7  ;;  %v408_v7 = vpop.permute.xlu1 %407 }
  0xfb   :  { %v291_v11 = vadd.f32 3.0, %v289_v8 }
  0xfc   :  { %v292_v12 = vadd.f32 3.0, %v290_v10 }
  0xfd   :  { %v293_v15 = vmax.f32 %v291_v11, 0.0 }
  0xfe   :  { %v294_v19 = vmax.f32 %v292_v12, 0.0 }
  0xff   :  { %v295_v20 = vmin.f32 %v293_v15, 6.0 }
 0x100   :  { %v296_v21 = vmin.f32 %v294_v19, 6.0 }
 0x101   :  { %v297_v22 = vmul.f32 %v295_v20, %v289_v8 }
 0x102   :  { %v298_v23 = vmul.f32 %v296_v21, %v290_v10 }
 0x103   :  { %v299_v25 = vmul.f32 0.16666667, %v297_v22 }
 0x104   :  { %v300_v27 = vmul.f32 0.16666667, %v298_v23 }
 0x105   :  { %v303_v28 = vcombine.high %v299_v25, %v299_v25  ;;  %v310_v29 = vrot.slane %v299_v25, %v1190_v17 }
 0x106   :  { %v352_v30 = vcombine.high %v300_v27, %v300_v27  ;;  %v359_v31 = vrot.slane %v300_v27, %v1190_v17 }
 0x107   :  { %v326_v9 = vrot.slane %v310_v29, %v1190_v17  ;;  %v318_v32 = vcombine.high %v310_v29, %v310_v29  ;;  %v317_v33 = vrot.slane %v303_v28, %v1190_v17 }
 0x108   :  { %v375_v34 = vrot.slane %v359_v31, %v1190_v17  ;;  %v367_v35 = vcombine.high %v359_v31, %v359_v31  ;;  %v366_v36 = vrot.slane %v352_v30, %v1190_v17 }
 0x109   :  { %v461_v38 = vrot.slane %v326_v9, %v1060_v14  ;;  %v348_v39 = vcombine.high %v326_v9, %v326_v9  ;;  %v340_v40 = vrot.slane %v318_v32, %v1190_v17  ;;  %v333_v41 = vrot.slane %v317_v33, %v1190_v17 }
 0x10a   :  { %v493_v43 = vrot.slane %v375_v34, %v1060_v14  ;;  %v397_v44 = vcombine.high %v375_v34, %v375_v34  ;;  %v389_v45 = vrot.slane %v367_v35, %v1190_v17  ;;  %v382_v46 = vrot.slane %v366_v36, %v1190_v17 }
 0x10b   :  { %v660_v47 = vmul.f32 %v610_v50, %v461_v38  ;;  %v1233_v48 = vrot.slane %v348_v39, %v1060_v14  ;;  %v1236_v49 = vrot.slane %v340_v40, %v1060_v14  ;;  %v1239_v51 = vrot.slane %v333_v41, %v1060_v14  ;;  %v422_v39 = vpop.permute.xlu1 %421 }
 0x10c   :  { %v668_v52 = vmul.f32 %v610_v50, %v493_v43  ;;  %v1242_v53 = vrot.slane %v397_v44, %v1060_v14  ;;  %v1245_v54 = vrot.slane %v389_v45, %v1060_v14  ;;  %v1248_v56 = vrot.slane %v382_v46, %v1060_v14 }
 0x10d   :  { %v677_v57 = vsel %vm676_vm1, %v660_v47, 0.0  ;;  %v662_v58 = vmul.f32 %v624_v13, %v1233_v48  ;;  %v661_v59 = vmul.f32 %v617_v6, %v1236_v49  ;;  %v664_v60 = vmul.f32 %v638_v24, %v1239_v51 }
 0x10e   :  { %v692_v61 = vsel %vm676_vm1, %v668_v52, 0.0  ;;  %v670_v50 = vmul.f32 %v624_v13, %v1242_v53  ;;  %v669_v62 = vmul.f32 %v617_v6, %v1245_v54  ;;  %v672_v63 = vmul.f32 %v638_v24, %v1248_v56  ;;  %v415_v24 = vpop.permute.xlu0 %414 }
 0x10f   :  { %v680_v1 = vsel %vm676_vm1, %v662_v58, 0.0  ;;  %v678_v2 = vsel %vm676_vm1, %v661_v59, 0.0  ;;  %v684_v3 = vsel %vm676_vm1, %v664_v60, 0.0  ;;  %v350_v4 = vcombine.high %v340_v40, %v340_v40 }
 0x110   :  { %v695_v8 = vsel %vm676_vm1, %v670_v50, 0.0  ;;  %v679_v10 = vadd.f32 %v678_v2, %v677_v57  ;;  %v693_v11 = vsel %vm676_vm1, %v669_v62, 0.0  ;;  %v699_v6 = vsel %vm676_vm1, %v672_v63, 0.0 }
 0x111   :  { %v694_v12 = vadd.f32 %v693_v11, %v692_v61  ;;  %v399_v13 = vcombine.high %v389_v45, %v389_v45  ;;  %v473_v15 = vrot.slane %v350_v4, %v1060_v14  ;;  %v349_v19 = vcombine.high %v333_v41, %v333_v41 }
 0x112   :  { %v681_v20 = vadd.f32 %v680_v1, %v679_v10  ;;  %v398_v21 = vcombine.high %v382_v46, %v382_v46  ;;  %v319_v22 = vcombine.high %v317_v33, %v317_v33  ;;  %v368_v23 = vcombine.high %v366_v36, %v366_v36  ;;  %v429_v58 = vpop.permute.xlu0 %428 }
 0x113   :  { %v505_v25 = vrot.slane %v399_v13, %v1060_v14  ;;  %v663_v27 = vmul.f32 %v1214_v16, %v473_v15  ;;  %v696_v28 = vadd.f32 %v695_v8, %v694_v12  ;;  %v1270_v29 = vrot.slane %v349_v19, %v1060_v14 }
 0x114   :  { %v1273_v30 = vrot.slane %v398_v21, %v1060_v14  ;;  %v347_v31 = vrot.slane %v319_v22, %v1190_v17  ;;  %v396_v9 = vrot.slane %v368_v23, %v1190_v17  ;;  %v538_v32 = vmul.f32 %v461_v38, %v408_v7 }
 0x115   :  { %v671_v33 = vmul.f32 %v1214_v16, %v505_v25  ;;  %v682_v34 = vsel %vm676_vm1, %v663_v27, 0.0  ;;  %v666_v35 = vmul.f32 %v652_v37, %v1270_v29  ;;  %v546_v36 = vmul.f32 %v493_v43, %v408_v7  ;;  %v436_v7 = vpop.permute.xlu1 %435 }
 0x116   :  { %v683_v40 = vadd.f32 %v682_v34, %v681_v20  ;;  %v674_v41 = vmul.f32 %v652_v37, %v1273_v30  ;;  %v481_v44 = vrot.slane %v347_v31, %v1060_v14  ;;  %v513_v45 = vrot.slane %v396_v9, %v1060_v14  ;;  %v443_v22 = vpop.permute.xlu0 %442 }
 0x117   :  { %v697_v46 = vsel %vm676_vm1, %v671_v33, 0.0  ;;  %v688_v17 = vsel %vm676_vm1, %v666_v35, 0.0  ;;  %v351_v38 = vcombine.high %v347_v31, %v347_v31  ;;  %v400_v47 = vcombine.high %v396_v9, %v396_v9 }
 0x118   :  { %v698_v16 = vadd.f32 %v697_v46, %v696_v28  ;;  %v703_v52 = vsel %vm676_vm1, %v674_v41, 0.0  ;;  %v665_v57 = vmul.f32 %v1216_v26, %v481_v44  ;;  %v673_v43 = vmul.f32 %v1216_v26, %v513_v45 }
 0x119   :  { %v685_v59 = vadd.f32 %v684_v3, %v683_v40  ;;  %v489_v37 = vrot.slane %v351_v38, %v1060_v14  ;;  %v1290_v60 = vrot.slane %v400_v47, %v1060_v14  ;;  %v555_v61 = vsel %vm554_vm2, %v538_v32, 0.0  ;;  %v450_v35 = vpop.permute.xlu1 %449 }
 0x11a   :  { %v686_v50 = vsel %vm676_vm1, %v665_v57, 0.0  ;;  %v700_v62 = vadd.f32 %v699_v6, %v698_v16  ;;  %v701_v63 = vsel %vm676_vm1, %v673_v43, 0.0  ;;  %v570_v1 = vsel %vm554_vm2, %v546_v36, 0.0 }
 0x11b   :  { %v687_v2 = vadd.f32 %v686_v50, %v685_v59  ;;  %v667_v4 = vmul.f32 %v1227_v42, %v489_v37  ;;  %v675_v26 = vmul.f32 %v1227_v42, %v1290_v60  ;;  %v539_v3 = vmul.f32 %v1236_v49, %v415_v24 }
 0x11c   :  { %v702_v14 = vadd.f32 %v701_v63, %v700_v62  ;;  %v547_v8 = vmul.f32 %v1245_v54, %v415_v24  ;;  %v540_v10 = vmul.f32 %v1233_v48, %v422_v39  ;;  %v548_v11 = vmul.f32 %v1242_v53, %v422_v39 }
 0x11d   :  { %v689_v6 = vadd.f32 %v688_v17, %v687_v2  ;;  %v690_v12 = vsel %vm676_vm1, %v667_v4, 0.0  ;;  %v705_v13 = vsel %vm676_vm1, %v675_v26, 0.0  ;;  %v556_v19 = vsel %vm554_vm2, %v539_v3, 0.0 }
 0x11e   :  { %v704_v20 = vadd.f32 %v703_v52, %v702_v14  ;;  %v557_v21 = vadd.f32 %v556_v19, %v555_v61  ;;  %v571_v42 = vsel %vm554_vm2, %v547_v8, 0.0  ;;  %v558_v49 = vsel %vm554_vm2, %v540_v10, 0.0  ;;  %v457_v52 = vpop.permute.xlu0 %456 }
 0x11f   :  { %v691_v23 = vadd.f32 %v690_v12, %v689_v6  ;;  %v572_v54 = vadd.f32 %v571_v42, %v570_v1  ;;  %v573_v48 = vsel %vm554_vm2, %v548_v11, 0.0  ;;  %v541_v24 = vmul.f32 %v473_v15, %v429_v58  ;;  %v589_v1 = vpop.permute.xlu1 %588 }
 0x120   :  { %v706_v53 = vadd.f32 %v705_v13, %v704_v20  ;;  %v559_v27 = vadd.f32 %v558_v49, %v557_v21  ;;  %v549_v28 = vmul.f32 %v505_v25, %v429_v58  ;;  %v542_v31 = vmul.f32 %v1239_v51, %v436_v7 }
 0x121   :  { %v713_v9 = vadd.f32 %v1258_v0, %v691_v23  ;;  %v574_v32 = vadd.f32 %v573_v48, %v572_v54  ;;  %v560_v33 = vsel %vm554_vm2, %v541_v24, 0.0  ;;  %v550_v34 = vmul.f32 %v1248_v56, %v436_v7 }
 0x122   :  { %v714_v36 = vadd.f32 %v1258_v0, %v706_v53  ;;  %v561_v39 = vadd.f32 %v560_v33, %v559_v27  ;;  %v575_v40 = vsel %vm554_vm2, %v549_v28, 0.0  ;;  %v562_v15 = vsel %vm554_vm2, %v542_v31, 0.0  ;;  %v921_v27 = vld [vmem:[%s1338_s3] ss:$8 sps:$4 sm:$0xff]   ;;  %s940_s3 = scalar_lea.vmem %s864_s4, 256 }
 0x123   :  { %v715_v41 = vsub.f32 0.0, %v713_v9  ;;  %v576_v46 = vadd.f32 %v575_v40, %v574_v32  ;;  %v577_v25 = vsel %vm554_vm2, %v550_v34, 0.0  ;;  %v543_v51 = vmul.f32 %v481_v44, %v443_v22  ;;  %p941_p0 = scmp.ne.s32.totalorder %s864_s4, %s940_s3  ;;  %p946_p2 = scmp.lt.s32.totalorder %s940_s3, %s940_s3 }
 0x124   :  { %v716_v17 = vsub.f32 0.0, %v714_v36  ;;  %v563_v38 = vadd.f32 %v562_v15, %v561_v39  ;;  %v551_v47 = vmul.f32 %v513_v45, %v443_v22  ;;  %v544_v16 = vmul.f32 %v1270_v29, %v450_v35 }
 0x125   :  { %v717_v56 = vmul.f32 1.442695, %v715_v41  ;;  %v578_v57 = vadd.f32 %v577_v25, %v576_v46  ;;  %v564_v0 = vsel %vm554_vm2, %v543_v51, 0.0  ;;  %v552_v43 = vmul.f32 %v1273_v30, %v450_v35  ;;  %p947_p3 = por %p946_p2, %p945_p1 }
 0x126   :  { %v719_v58 = vmul.f32 1.442695, %v716_v17  ;;  %v565_v59 = vadd.f32 %v564_v0, %v563_v38  ;;  %v579_v61 = vsel %vm554_vm2, %v551_v47, 0.0  ;;  %v566_v44 = vsel %vm554_vm2, %v544_v16, 0.0 }
 0x127   :  { %924 = vpow2.f32 %v717_v56  ;;  %v580_v50 = vadd.f32 %v579_v61, %v578_v57  ;;  %v545_v62 = vmul.f32 %v489_v37, %v457_v52  ;;  %v581_v45 = vsel %vm554_vm2, %v552_v43, 0.0  ;;  %p948_p4 = pnand %p947_p3, %p941_p0 }
 0x128   :  { %926 = vpow2.f32 %v719_v58  ;;  %v553_v29 = vmul.f32 %v1290_v60, %v457_v52  ;;  %v567_v63 = vadd.f32 %v566_v44, %v565_v59 }
 0x129   :  { %v568_v2 = vsel %vm554_vm2, %v545_v62, 0.0  ;;  %v582_v4 = vadd.f32 %v581_v45, %v580_v50 }
 0x12a   :  { %v569_v30 = vadd.f32 %v568_v2, %v567_v63  ;;  %v583_v26 = vsel %vm554_vm2, %v553_v29, 0.0 }
 0x12b   :  { %v584_v3 = vadd.f32 %v583_v26, %v582_v4 }
 0x12c   :  { %v591_v7 = vadd.f32 %v589_v1, %v569_v30 }
 0x12d   :  { %v592_v14 = vadd.f32 %v589_v1, %v584_v3 }
 0x12e   :  { %v593_v8 = vsub.f32 0.0, %v591_v7 }
 0x12f   :  { %v594_v10 = vsub.f32 0.0, %v592_v14 }
 0x130   :  { %v595_v11 = vmul.f32 1.442695, %v593_v8 }
 0x131   :  { %v597_v37 = vmul.f32 1.442695, %v594_v10 }
 0x132   :  { %928 = vpow2.f32 %v595_v11 }
 0x133   :  { %930 = vpow2.f32 %v597_v37 }
 0x134   :  { %v925_v6 = vpop.eup %924 }
 0x135   :  { %v927_v12 = vpop.eup %926  ;;  %v721_v60 = vadd.f32 1.0, %v925_v6 }
 0x136   :  { %v722_v13 = vadd.f32 1.0, %v927_v12 }
 0x137   :  { %932 = vrcp.f32 %v721_v60 }
 0x138   :  { %934 = vrcp.f32 %v722_v13 }
 0x13f   :  { %v929_v19 = vpop.eup %928 }
 0x140   :  { %v931_v20 = vpop.eup %930  ;;  %v599_v21 = vadd.f32 1.0, %v929_v19 }
 0x141   :  { %v600_v42 = vadd.f32 1.0, %v931_v20 }
 0x142   :  { %936 = vrcp.f32 %v599_v21 }
 0x143   :  { %938 = vrcp.f32 %v600_v42 }
 0x144   :  { %v933_v49 = vpop.eup %932 }
 0x145   :  { %v935_v22 = vpop.eup %934 }
 0x146   :  { %v789_v23 = vcombine.low %v933_v49, %v935_v22 }
 0x148   :  { %v791_v54 = vpack.c.bf16 %v789_v23, %v789_v23 }
 0x14a   :  { %795 = vrot.lane.b32.xlu0 %v791_v54, %s964_s2 }
 0x14f   :  { %v937_v48 = vpop.eup %936 }
 0x150   :  { %v939_v24 = vpop.eup %938 }
 0x151   :  { %v727_v53 = vcombine.low %v937_v48, %v939_v24 }
 0x153   :  { %v729_v28 = vpack.c.bf16 %v727_v53, %v727_v53 }
 0x155   :  { %873 = vmatmul.mubr.msk.bf16.vlgmr.msra.gmra.mxu1 %vm742_vm3, %v729_v28 }
 0x156   :  { %825 = vmatpush1.bf16.msra.mxu1 %v921_v27  ;;  %842 = vmatprep.mubr.bf16.mxu1 %v962_v5 }
 0x1bc   :  { %v796_v31 = vpop.permute.xlu0 %795 }
 0x1bd   :  { %876 = vmatmul.mubr.msk.bf16.vlgmr.msra.gmra.mxu1 %vm742_vm3, %v796_v31 }
 0x215   :  { %v780_v9 = vpop.f32.mrf.mxu1 }
 0x216   :  { %v851_v35 = vmul.f32 %v780_v9, %v1163_v55 }
 0x217   :  { %v782_v32 = vpop.f32.mrf.mxu1 }
 0x218   :  { %v852_v39 = vmul.f32 %v782_v32, %v1074_v18 }
 0x219   :  { %v784_v33 = vpop.f32.mrf.mxu1 }
 0x21b   :  { %v785_v34 = vpop.f32.mrf.mxu1 }
 0x27d   :  { %v844_v36 = vpop.f32.mrf.mxu1 }
 0x27e   :  { %v853_v40 = vmul.f32 %v851_v35, %v844_v36 }
 0x27f   :  { %v846_v15 = vpop.f32.mrf.mxu1 }
 0x280   :  { %855 = vst [vmem:[#allocation2] sm:$0xff] %v853_v40  ;;  %v854_v41 = vmul.f32 %v852_v39, %v846_v15 }
 0x281   :  { %v848_v46 = vpop.f32.mrf.mxu1 }
 0x282   :  { %856 = vst [vmem:[#allocation2 + $0x8] sm:$0xff] %v854_v41 }
 0x283   :  { %v849_v5 = vpop.f32.mrf.mxu1 }
 0x284   :  { %951 = shalt.err (!%p948_p4)
}
 0x285   :  { %866 = dma.vmem_to_hbm [thread:$0]  %s864_s4, 256, %s1345_s10, [#allocation3]  }
 0x286   :  { %960 = dma.done.wait [#allocation3], 256  }
 0x287   :  { %961 = vsyncadd [#allocation3], 4294967040 }
 0x288   :  { %870 = vsyncpa [#allocation3], 1 }

</bundles_post_ra>
